<compile_context>
chip_gen: v5e
topology: v5e:2x2
jax: 0.10.0
libtpu: 0.0.40
codegen_flags: <defaults>
</compile_context>

<pallas_src>
import jax
import jax.numpy as jnp
from jax.experimental import pallas as pl
from jax.experimental.pallas import tpu as pltpu


# ---------------------------------------------------------------------------
# Kernel: one MXU GEMM per row tile against a resident weight.
# ---------------------------------------------------------------------------
def _patch_embed_kernel(p_ref, w_ref, o_ref):
    # p_ref: (tm, Kp)  patch-row tile (compute dtype, e.g. bf16)
    # w_ref: (Kp, E)   flattened conv weight, constant block index -> fetched once
    # o_ref: (tm, E)   output tile
    o_ref[...] = jnp.dot(
        p_ref[...], w_ref[...], preferred_element_type=jnp.float32
    ).astype(o_ref.dtype)


# ---------------------------------------------------------------------------
# Tiling helpers
# ---------------------------------------------------------------------------
_VMEM_BUDGET_BYTES = 24 * 1024 * 1024   # per-step footprint budget (fits v7x scoped 32 MiB)
_VMEM_LIMIT_BYTES = 32 * 1024 * 1024    # raise v5e's 16 MiB scoped default; safe on v6e/v7x


def _round_up(x: int, m: int) -> int:
    return ((x + m - 1) // m) * m


def _pick_row_tile(M: int, Kp: int, E: int, in_bytes: int, out_bytes: int) -> int:
    """Largest 128-multiple row tile whose double-buffered footprint fits the budget."""

    def footprint(tm: int) -> int:
        # Streamed patch + output tiles are double-buffered; count the (constant-index)
        # resident weight twice as well to stay conservative.
        return 2 * (tm * Kp * in_bytes + Kp * E * in_bytes + tm * E * out_bytes)

    tm = 128
    for cand in (2048, 1024, 512, 256, 128):
        if footprint(cand) <= _VMEM_BUDGET_BYTES:
            tm = cand
            break
    if M <= tm:
        return M            # single full-extent block (always a legal block shape)
    return tm


# ---------------------------------------------------------------------------
# Wrapper: full PatchEmbedding forward
# ---------------------------------------------------------------------------
def patch_embedding(x: jnp.ndarray, conv_weight: jnp.ndarray,
                    *, compute_dtype=jnp.bfloat16) -> jnp.ndarray:
    """x: (B, C, H, W), conv_weight: (E, C, P, P) -> squeeze((B, (H/P)*(W/P), E))."""
    B, C, H, W = x.shape
    E, Cw, P, Pw = conv_weight.shape
    assert Cw == C and Pw == P, "weight layout must be (E, C, P, P)"
    assert H % P == 0 and W % P == 0, "spatial dims must be divisible by patch_size"

    hp, wp = H // P, W // P
    N = hp * wp                 # patches per image
    K = C * P * P               # flattened patch length
    M = B * N                   # total output rows

    out_dtype = x.dtype
    in_bytes = jnp.dtype(compute_dtype).itemsize
    out_bytes = jnp.dtype(out_dtype).itemsize

    # Pad the contraction dim to a lane-aligned multiple of 128 (zero rows/cols are
    # exact no-ops for the dot).
    Kp = _round_up(K, 128)

    tm = _pick_row_tile(M, Kp, E, in_bytes, out_bytes)
    Mp = _round_up(M, tm)
    grid = (pl.cdiv(Mp, tm),)

    # --- layout plumbing (XLA side) -----------------------------------------
    # Patchify: (B,C,H,W) -> (B,hp,wp,C,P,P) -> (M,K); row order matches torch's
    # permute(0,2,3,1)+view. The bf16 cast and zero-pad fuse into the same producer;
    # allow_input_fusion lets XLA fold the whole chain into the kernel input when
    # supported, avoiding a materialized (M,K) copy in HBM.
    patches = x.reshape(B, C, hp, P, wp, P)
    patches = jnp.transpose(patches, (0, 2, 4, 1, 3, 5)).reshape(M, K)
    patches = patches.astype(compute_dtype)
    if Mp != M or Kp != K:
        patches = jnp.pad(patches, ((0, Mp - M), (0, Kp - K)))

    w2d = conv_weight.reshape(E, K).T.astype(compute_dtype)     # (K, E)
    if Kp != K:
        w2d = jnp.pad(w2d, ((0, Kp - K), (0, 0)))

    grid_spec = pltpu.PrefetchScalarGridSpec(
        num_scalar_prefetch=0,
        grid=grid,
        in_specs=[
            pl.BlockSpec((tm, Kp), lambda i: (i, 0)),   # stream patch-row tiles
            pl.BlockSpec((Kp, E), lambda i: (0, 0)),    # weight resident (constant index)
        ],
        out_specs=pl.BlockSpec((tm, E), lambda i: (i, 0)),
    )

    cost = pl.CostEstimate(
        flops=2 * M * E * K,
        bytes_accessed=M * Kp * in_bytes + Kp * E * in_bytes + M * E * out_bytes,
        transcendentals=0,
    )

    out2d = pl.pallas_call(
        _patch_embed_kernel,
        out_shape=jax.ShapeDtypeStruct((Mp, E), out_dtype),
        grid_spec=grid_spec,
        compiler_params=pltpu.CompilerParams(
            dimension_semantics=("parallel",),          # rows split across TCs on v7x
            vmem_limit_bytes=_VMEM_LIMIT_BYTES,
            allow_input_fusion=[True, False],
        ),
        cost_estimate=cost,
    )(patches, w2d)

    out = out2d[:M].reshape(B, N, E)
    # torch: x.squeeze() removes every size-1 dim (e.g. batch of 1).
    return jnp.squeeze(out)


# ---------------------------------------------------------------------------
# Demo / correctness check
# ---------------------------------------------------------------------------
if __name__ == "__main__":
    # Small but representative shapes: batch=2, in_channels=4, 16x16 image,
    # patch_size=4 -> 16 patches/image, embedding_dim=128.
    B, C, H, W = 2, 4, 16, 16
    P = 4
    E = 128

    key = jax.random.PRNGKey(0)
    k_x, k_w = jax.random.split(key)

    x = jax.random.normal(k_x, (B, C, H, W), dtype=jnp.float32)

    # Kaiming-normal init (fan_in = C*P*P) scaled by 0.1, as in the module.
    fan_in = C * P * P
    std = (2.0 / fan_in) ** 0.5
    conv_weight = jax.random.normal(k_w, (E, C, P, P), dtype=jnp.float32) * std * 0.1

    out = patch_embedding(x, conv_weight)
    out = jax.block_until_ready(out)

    # Reference: strided conv (exactly what the PyTorch module computes), then the same
    # permute/reshape/squeeze.
    ref = jax.lax.conv_general_dilated(
        x,
        conv_weight,
        window_strides=(P, P),
        padding="VALID",
        dimension_numbers=("NCHW", "OIHW", "NCHW"),
        precision=jax.lax.Precision.HIGHEST,
    )
    ref = jnp.transpose(ref, (0, 2, 3, 1)).reshape(B, (H // P) * (W // P), E)
    ref = jnp.squeeze(ref)

    assert out.shape == ref.shape, (out.shape, ref.shape)
    # Tolerance covers the bf16 input rounding (f32 accumulation) vs the f32 HIGHEST conv.
    assert jnp.allclose(out, ref.astype(out.dtype), atol=2e-2, rtol=2e-2), float(
        jnp.max(jnp.abs(out - ref))
    )

    print("KERNEL_OK")
</pallas_src>

<mosaic_0001>
module attributes {stable_mosaic.version = 11 : i64} {
  func.func @_patch_embed_kernel(%arg0: i32, %arg1: memref<32x128xbf16, #tpu.memory_space<vmem>>, %arg2: memref<128x128xbf16, #tpu.memory_space<vmem>>, %arg3: memref<32x128xf32, #tpu.memory_space<vmem>>) attributes {dimension_semantics = [#tpu.dimension_semantics<parallel>], iteration_bounds = array<i64: 1>, scalar_prefetch = 0 : i64, scratch_operands = 0 : i64, tpu.core_type = #tpu.core_type<tc>, window_params = [{transform_indices = @transform_0, window_bounds = array<i64: 32, 128>}, {pipeline_mode = #tpu.pipeline_mode<synchronous>, transform_indices = @transform_1, window_bounds = array<i64: 128, 128>}, {transform_indices = @transform_2, window_bounds = array<i64: 32, 128>}]} {
    %c0 = arith.constant 0 : index
    %c0_0 = arith.constant 0 : index
    %0 = vector.load %arg1[%c0, %c0_0] : memref<32x128xbf16, #tpu.memory_space<vmem>>, vector<32x128xbf16>
    %c0_1 = arith.constant 0 : index
    %c0_2 = arith.constant 0 : index
    %1 = vector.load %arg2[%c0_1, %c0_2] : memref<128x128xbf16, #tpu.memory_space<vmem>>, vector<128x128xbf16>
    %cst = arith.constant dense<0.000000e+00> : vector<32x128xf32>
    %2 = tpu.matmul %0, %1, %cst {dimension_numbers = #tpu.dot_dimension_numbers<[1], [0], [0], [1], [0, 0, 1, 1], [], []>} : vector<32x128xbf16>, vector<128x128xbf16>, vector<32x128xf32> -> vector<32x128xf32>
    %c0_3 = arith.constant 0 : index
    %c0_4 = arith.constant 0 : index
    %3 = vector.load %arg3[%c0_3, %c0_4] : memref<32x128xf32, #tpu.memory_space<vmem>>, vector<32x128xf32>
    tpu.vector_store %arg3[%c0_3, %c0_4], %2 {strides = array<i32>} : memref<32x128xf32, #tpu.memory_space<vmem>>, vector<32x128xf32>,
    return
  }
  func.func @transform_0(%arg0: i32) -> (i32, i32) {
    %c0_i32 = arith.constant 0 : i32
    %c0_i32_0 = arith.constant 0 : i32
    return %arg0, %c0_i32 : i32, i32
  }
  func.func @transform_1(%arg0: i32) -> (i32, i32) {
    %c0_i32 = arith.constant 0 : i32
    %c0_i32_0 = arith.constant 0 : i32
    %c0_i32_1 = arith.constant 0 : i32
    return %c0_i32, %c0_i32_0 : i32, i32
  }
  func.func @transform_2(%arg0: i32) -> (i32, i32) {
    %c0_i32 = arith.constant 0 : i32
    %c0_i32_0 = arith.constant 0 : i32
    return %arg0, %c0_i32 : i32, i32
  }
}

</mosaic_0001>

<bundles_post_ra>
// kernel: tpu_custom_call.1
= control target key start
LH: loop header
LB: loop body
LE: loop exit
PB: predicated region body
PF: predicated region fallthrough
CT: control target
= control target key end

     0   :  { %7 = vsyncpa [#allocation3], 0  ;;  %s341_s0 = inlined_call_operand.hbm [shape: bf16[32,128], index: 0, kind: input, shape index: {}]   ;;  %s342_s1 = inlined_call_operand.hbm [shape: bf16[128,128], index: 1, kind: input, shape index: {}]   ;;  %s343_s2 = inlined_call_operand.hbm [shape: f32[32,128], index: 2, kind: output, shape index: {}]  }
   0x1   :  { %8 = vsyncpa [#allocation6], 0 }
   0x2   :  { %9 = vsyncpa [#allocation4], 0  ;;  %s14_s11 = sshll.u32 %s341_s0, 4  ;;  %s310_s12 = smov [#allocation2]   ;;  %s15_s11 = int_to_ptr.hbm [resolvable:$true] %s14_s11 }
   0x3   :  { %s16_s13 = sshll.u32 %s310_s12, 4  ;;  %s27_s16 = sshll.u32 %s342_s1, 4  ;;  %s17_s13 = int_to_ptr.vmem [resolvable:$true] %s16_s13  ;;  %s28_s16 = int_to_ptr.hbm [resolvable:$true] %s27_s16 }
   0x4   :  { %s311_s17 = smov 64   ;;  %s312_s18 = smov 4  }
   0x5   :  { %22 = dma.hbm_to_vmem [thread:$0]  %s15_s11, 256, %s17_s13, [#allocation3], %s311_s17, %s311_s17, %s312_s18  }
   0x6   :  { %s313_s19 = smov [#allocation5]  }
   0x7   :  { %s29_s20 = sshll.u32 %s313_s19, 4  ;;  %s30_s20 = int_to_ptr.vmem [resolvable:$true] %s29_s20 }
   0x8   :  { %35 = dma.hbm_to_vmem [thread:$0]  %s28_s16, 1024, %s30_s20, [#allocation6], %s311_s17, %s311_s17, %s312_s18  }
   0x9   :  { %304 = dma.done.wait [#allocation3], 256  }
   0xa   :  { %305 = vsyncadd [#allocation3], 4294967040 }
   0xb   :  { %306 = dma.done.wait [#allocation6], 1024  }
   0xc   :  { %307 = vsyncadd [#allocation6], 4294966272  ;;  %v216_v0 = vld [vmem:[#allocation5 + $0x38] sm:$0xff]  ;;  %v215_v1 = vld [vmem:[#allocation5 + $0x30] sm:$0xff]  ;;  %s314_s0 = smov [#allocation7]   ;;  %s153_s23 = sshll.u32 %s343_s2, 4  ;;  %s154_s23 = int_to_ptr.hbm [resolvable:$true] %s153_s23 }
   0xd   :  { %124 = vmatpush.bf16.msra.mxu0 %v216_v0  ;;  %217 = vmatpush.bf16.msra.mxu1 %v216_v0  ;;  %v214_v2 = vld [vmem:[#allocation5 + $0x28] sm:$0xff]  ;;  %v213_v3 = vld [vmem:[#allocation5 + $0x20] sm:$0xff]  ;;  %v212_v4 = vld [vmem:[#allocation5 + $0x18] sm:$0xff]  ;;  %s151_s1 = sshll.u32 %s314_s0, 4  ;;  %s315_s24 = smov 128   ;;  %s152_s1 = int_to_ptr.vmem [resolvable:$true] %s151_s1 }
   0xe   :  { %v211_v5 = vld [vmem:[#allocation5 + $0x10] sm:$0xff]  ;;  %v210_v6 = vld [vmem:[#allocation5 + $0x8] sm:$0xff]  ;;  %v209_v7 = vld [vmem:[#allocation5] sm:$0xff]  ;;  %s316_s25 = smov 8  }
   0xf   :  { %v207_v8 = vld [vmem:[#allocation2] sm:$0xff]  ;;  %v208_v9 = vld [vmem:[#allocation2 + $0x8] sm:$0xff] }
  0x11   :  { %125 = vmatpush.bf16.msra.mxu0 %v215_v1  ;;  %218 = vmatpush.bf16.msra.mxu1 %v215_v1 }
  0x15   :  { %126 = vmatpush.bf16.msra.mxu0 %v214_v2  ;;  %219 = vmatpush.bf16.msra.mxu1 %v214_v2 }
  0x19   :  { %127 = vmatpush.bf16.msra.mxu0 %v213_v3  ;;  %220 = vmatpush.bf16.msra.mxu1 %v213_v3 }
  0x1d   :  { %128 = vmatpush.bf16.msra.mxu0 %v212_v4  ;;  %221 = vmatpush.bf16.msra.mxu1 %v212_v4 }
  0x21   :  { %129 = vmatpush.bf16.msra.mxu0 %v211_v5  ;;  %222 = vmatpush.bf16.msra.mxu1 %v211_v5 }
  0x25   :  { %130 = vmatpush.bf16.msra.mxu0 %v210_v6  ;;  %223 = vmatpush.bf16.msra.mxu1 %v210_v6 }
  0x29   :  { %131 = vmatpush.bf16.msra.mxu0 %v209_v7  ;;  %224 = vmatpush.bf16.msra.mxu1 %v209_v7 }
  0x2c   :  { %132 = vmatmul.bf16.vlgmr.msra.gmra.mxu0 %v207_v8  ;;  %137 = vmatmul.bf16.vlgmr.msra.gmra.mxu1 %v208_v9 }
  0xa9   :  { %v133_v10 = vpop.f32.mrf.mxu0  ;;  %v138_v11 = vpop.f32.mrf.mxu1 }
  0xaa   :  { %143 = vst [vmem:[#allocation7] sm:$0xff] %v133_v10 }
  0xab   :  { %145 = vst [vmem:[#allocation7 + $0x10] sm:$0xff] %v138_v11 }
  0xb1   :  { %v135_v12 = vpop.f32.mrf.mxu0  ;;  %v140_v13 = vpop.f32.mrf.mxu1 }
  0xb2   :  { %144 = vst [vmem:[#allocation7 + $0x8] sm:$0xff] %v135_v12 }
  0xb3   :  { %146 = vst [vmem:[#allocation7 + $0x18] sm:$0xff] %v140_v13 }
  0xb4   :  { %159 = dma.vmem_to_hbm [thread:$0]  %s152_s1, 512, %s154_s23, [#allocation4], %s315_s24, %s315_s24, %s316_s25  }
  0xb5   :  { %308 = dma.done.wait [#allocation4], 512  }
  0xb6   :  { %309 = vsyncadd [#allocation4], 4294966784 }
  0xb7   :  { %164 = vsyncpa [#allocation3], 1 }
  0xb8   :  { %165 = vsyncpa [#allocation6], 1 }
  0xb9   :  { %166 = vsyncpa [#allocation4], 1 }

</bundles_post_ra>
